<compile_context>
chip_gen: v5e
topology: v5e:2x2
jax: 0.10.0
libtpu: 0.0.40
codegen_flags: <defaults>
</compile_context>

<pallas_src>
import jax
import jax.numpy as jnp
from jax.experimental import pallas as pl
from jax.experimental.pallas import tpu as pltpu


def _round_up(a, m):
    return -(-a // m) * m


def _make_kernel(mxu_dtype):
    def kernel(x_ref, w1_ref, b1_ref, w2_ref, b2_ref,
               w3_ref, b3_ref, w4_ref, b4_ref, o_ref):
        # Weights/biases are grid-invariant (block (0,0) every step) -> they
        # stay VMEM-resident; the x/out path is pure streaming per batch tile.
        def mm(a, w_ref):
            return jnp.dot(a.astype(mxu_dtype), w_ref[...].astype(mxu_dtype),
                           preferred_element_type=jnp.float32)

        x = x_ref[...]
        # model_1
        h = jnp.maximum(mm(x, w1_ref) + b1_ref[...], 0.0)
        h = jnp.maximum(mm(h, w2_ref) + b2_ref[...], 0.0)
        # model_2
        h = jnp.maximum(mm(h, w3_ref) + b3_ref[...], 0.0)
        logits = mm(h, w4_ref) + b4_ref[...]

        # Numerically-stable softmax over the 10 classes (all f32).
        m = jnp.max(logits, axis=1, keepdims=True)
        e = jnp.exp(logits - m)
        s = jnp.sum(e, axis=1, keepdims=True)
        inv = pl.reciprocal(s, approx=True)      # EUP vrcp (~1e-4 rel err)
        inv = inv * (2.0 - s * inv)              # one Newton step -> ~1e-7
        o_ref[...] = (e * inv).astype(o_ref.dtype)

    return kernel


def combined_model(x, params, *, tile_b=4096, min_tiles=8,
                   mxu_dtype=jnp.bfloat16,
                   vmem_budget_bytes=10 * 1024 * 1024):
    w1, b1, w2, b2, w3, b3, w4, b4 = params
    B, d_in = x.shape
    n_out = w4.shape[1]

    # --- batch tile selection -------------------------------------------
    # Rough per-row VMEM bytes: double-buffered x/out blocks (f32), f32
    # intermediates (h1,h2,h3,logits,e), bf16 LHS copies for the MXU.
    row_bytes = (4 * (2 * d_in + 2 * n_out)
                 + 4 * (64 + 32 + 32 + 2 * n_out)
                 + 2 * (d_in + 64 + 32 + 32))
    vmem_cap = max(8, (vmem_budget_bytes // row_bytes) // 8 * 8)

    tile = min(tile_b, vmem_cap)
    # Prefer >= min_tiles grid steps (v7x dual-TC sharding + pipeline overlap)
    # before growing the tile; never shrink below 8 rows (f32 sublanes).
    tile = min(tile, max(8, _round_up(pl.cdiv(B, min_tiles), 8)))
    # Never exceed the (sublane-padded) batch.
    tile = max(8, min(tile, _round_up(B, 8)))

    b_pad = _round_up(B, tile)
    if b_pad != B:
        x = jnp.pad(x, ((0, b_pad - B), (0, 0)))
    n_tiles = b_pad // tile

    def resident(shape):
        # Same block every grid step -> stays VMEM-resident across the grid.
        return pl.BlockSpec(shape, lambda i: tuple(0 for _ in shape))

    flops = 2 * b_pad * (d_in * 64 + 64 * 32 + 32 * 32 + 32 * n_out)
    bytes_accessed = 4 * (b_pad * d_in + b_pad * n_out
                          + w1.size + b1.size + w2.size + b2.size
                          + w3.size + b3.size + w4.size + b4.size)

    out = pl.pallas_call(
        _make_kernel(mxu_dtype),
        out_shape=jax.ShapeDtypeStruct((b_pad, n_out), jnp.float32),
        grid=(n_tiles,),
        in_specs=[
            pl.BlockSpec((tile, d_in), lambda i: (i, 0)),
            resident(w1.shape), resident(b1.shape),
            resident(w2.shape), resident(b2.shape),
            resident(w3.shape), resident(b3.shape),
            resident(w4.shape), resident(b4.shape),
        ],
        # Lean output block: full 10-class last dim (no 128-lane padding).
        out_specs=pl.BlockSpec((tile, n_out), lambda i: (i, 0)),
        compiler_params=pltpu.CompilerParams(
            dimension_semantics=("parallel",)),
        cost_estimate=pl.CostEstimate(
            flops=flops,
            transcendentals=b_pad * n_out,
            bytes_accessed=bytes_accessed),
    )(x, w1, b1, w2, b2, w3, b3, w4, b4)

    return out[:B] if b_pad != B else out


def init_params(key, input_size):
    # PyTorch-style uniform(-1/sqrt(fan_in), 1/sqrt(fan_in)) init.
    dims = [(input_size, 64), (64, 32), (32, 32), (32, 10)]
    params = []
    keys = jax.random.split(key, 2 * len(dims))
    for i, (fan_in, fan_out) in enumerate(dims):
        bound = 1.0 / jnp.sqrt(jnp.float32(fan_in))
        w = jax.random.uniform(keys[2 * i], (fan_in, fan_out),
                               minval=-bound, maxval=bound, dtype=jnp.float32)
        b = jax.random.uniform(keys[2 * i + 1], (1, fan_out),
                               minval=-bound, maxval=bound, dtype=jnp.float32)
        params += [w, b]
    return tuple(params)


def reference(x, params, mxu_dtype=jnp.float32):
    w1, b1, w2, b2, w3, b3, w4, b4 = params

    def mm(a, w):
        return jnp.dot(a.astype(mxu_dtype), w.astype(mxu_dtype),
                       preferred_element_type=jnp.float32)

    h = jnp.maximum(mm(x, w1) + b1, 0.0)
    h = jnp.maximum(mm(h, w2) + b2, 0.0)
    h = jnp.maximum(mm(h, w3) + b3, 0.0)
    return jax.nn.softmax(mm(h, w4) + b4, axis=1)


if __name__ == "__main__":
    input_size = 32
    key = jax.random.PRNGKey(0)
    kx, kp, kx2 = jax.random.split(key, 3)
    params = init_params(kp, input_size)

    # ---- exact-semantics path (f32 MXU), single tile -----------------------
    batch = 8
    x = jax.random.normal(kx, (batch, input_size), dtype=jnp.float32)
    out_f32 = jax.block_until_ready(
        combined_model(x, params, mxu_dtype=jnp.float32))
    ref_f32 = reference(x, params)
    assert out_f32.shape == (batch, 10)
    assert jnp.allclose(out_f32, ref_f32, atol=1e-5), "f32 path mismatch (B=8)"
    assert jnp.allclose(jnp.sum(out_f32, axis=1), 1.0, atol=1e-5)

    # ---- default fast path (bf16 MXU operands, f32 accumulation) -----------
    out_bf = jax.block_until_ready(combined_model(x, params))
    ref_bf = reference(x, params, mxu_dtype=jnp.bfloat16)  # matched precision
    assert out_bf.shape == (batch, 10)
    assert jnp.allclose(out_bf, ref_bf, atol=1e-4), "bf16 path mismatch (B=8)"
    assert jnp.allclose(out_bf, ref_f32, atol=2e-2), "bf16 path far from f32 ref"
    assert jnp.allclose(jnp.sum(out_bf, axis=1), 1.0, atol=1e-5)

    # ---- ragged batch exercising the multi-tile grid + row padding ---------
    batch2 = 300
    x2 = jax.random.normal(kx2, (batch2, input_size), dtype=jnp.float32)
    out2 = jax.block_until_ready(combined_model(x2, params))       # 8 tiles
    ref2_bf = reference(x2, params, mxu_dtype=jnp.bfloat16)
    ref2_f32 = reference(x2, params)
    assert out2.shape == (batch2, 10)
    assert jnp.allclose(out2, ref2_bf, atol=1e-4), "bf16 path mismatch (B=300)"
    assert jnp.allclose(out2, ref2_f32, atol=2e-2), "bf16 far from f32 (B=300)"
    assert jnp.allclose(jnp.sum(out2, axis=1), 1.0, atol=1e-5)

    out2_f32 = jax.block_until_ready(
        combined_model(x2, params, mxu_dtype=jnp.float32))
    assert jnp.allclose(out2_f32, ref2_f32, atol=1e-5), "f32 path mismatch (B=300)"

    print("KERNEL_OK")
</pallas_src>

<mosaic_0001>
module attributes {stable_mosaic.version = 11 : i64} {
  func.func @kernel(%arg0: i32, %arg1: memref<8x32xf32, #tpu.memory_space<vmem>>, %arg2: memref<32x64xf32, #tpu.memory_space<vmem>>, %arg3: memref<1x64xf32, #tpu.memory_space<vmem>>, %arg4: memref<64x32xf32, #tpu.memory_space<vmem>>, %arg5: memref<1x32xf32, #tpu.memory_space<vmem>>, %arg6: memref<32x32xf32, #tpu.memory_space<vmem>>, %arg7: memref<1x32xf32, #tpu.memory_space<vmem>>, %arg8: memref<32x10xf32, #tpu.memory_space<vmem>>, %arg9: memref<1x10xf32, #tpu.memory_space<vmem>>, %arg10: memref<8x10xf32, #tpu.memory_space<vmem>>) attributes {dimension_semantics = [#tpu.dimension_semantics<parallel>], iteration_bounds = array<i64: 1>, scalar_prefetch = 0 : i64, scratch_operands = 0 : i64, tpu.core_type = #tpu.core_type<tc>, window_params = [{transform_indices = @transform_0, window_bounds = array<i64: 8, 32>}, {pipeline_mode = #tpu.pipeline_mode<synchronous>, transform_indices = @transform_1, window_bounds = array<i64: 32, 64>}, {pipeline_mode = #tpu.pipeline_mode<synchronous>, transform_indices = @transform_2, window_bounds = array<i64: 1, 64>}, {pipeline_mode = #tpu.pipeline_mode<synchronous>, transform_indices = @transform_3, window_bounds = array<i64: 64, 32>}, {pipeline_mode = #tpu.pipeline_mode<synchronous>, transform_indices = @transform_4, window_bounds = array<i64: 1, 32>}, {pipeline_mode = #tpu.pipeline_mode<synchronous>, transform_indices = @transform_5, window_bounds = array<i64: 32, 32>}, {pipeline_mode = #tpu.pipeline_mode<synchronous>, transform_indices = @transform_6, window_bounds = array<i64: 1, 32>}, {pipeline_mode = #tpu.pipeline_mode<synchronous>, transform_indices = @transform_7, window_bounds = array<i64: 32, 10>}, {pipeline_mode = #tpu.pipeline_mode<synchronous>, transform_indices = @transform_8, window_bounds = array<i64: 1, 10>}, {transform_indices = @transform_9, window_bounds = array<i64: 8, 10>}]} {
    %c0 = arith.constant 0 : index
    %c0_0 = arith.constant 0 : index
    %0 = vector.load %arg1[%c0, %c0_0] : memref<8x32xf32, #tpu.memory_space<vmem>>, vector<8x32xf32>
    %c0_1 = arith.constant 0 : index
    %c0_2 = arith.constant 0 : index
    %1 = vector.load %arg2[%c0_1, %c0_2] : memref<32x64xf32, #tpu.memory_space<vmem>>, vector<32x64xf32>
    %cst = arith.constant dense<0.000000e+00> : vector<8x64xf32>
    %2 = tpu.matmul %0, %1, %cst {dimension_numbers = #tpu.dot_dimension_numbers<[1], [0], [0], [1], [0, 0, 1, 1], [], []>} : vector<8x32xf32>, vector<32x64xf32>, vector<8x64xf32> -> vector<8x64xf32>
    %c0_3 = arith.constant 0 : index
    %c0_4 = arith.constant 0 : index
    %3 = vector.load %arg3[%c0_3, %c0_4] : memref<1x64xf32, #tpu.memory_space<vmem>>, vector<1x64xf32>
    %4 = vector.broadcast %3 : vector<1x64xf32> to vector<8x64xf32>
    %5 = arith.addf %2, %4 : vector<8x64xf32>
    %cst_5 = arith.constant 0.000000e+00 : f32
    %6 = vector.broadcast %cst_5 : f32 to vector<8x64xf32>
    %7 = arith.maximumf %5, %6 : vector<8x64xf32>
    %c0_6 = arith.constant 0 : index
    %c0_7 = arith.constant 0 : index
    %8 = vector.load %arg4[%c0_6, %c0_7] : memref<64x32xf32, #tpu.memory_space<vmem>>, vector<64x32xf32>
    %cst_8 = arith.constant dense<0.000000e+00> : vector<8x32xf32>
    %9 = tpu.matmul %7, %8, %cst_8 {dimension_numbers = #tpu.dot_dimension_numbers<[1], [0], [0], [1], [0, 0, 1, 1], [], []>} : vector<8x64xf32>, vector<64x32xf32>, vector<8x32xf32> -> vector<8x32xf32>
    %c0_9 = arith.constant 0 : index
    %c0_10 = arith.constant 0 : index
    %10 = vector.load %arg5[%c0_9, %c0_10] : memref<1x32xf32, #tpu.memory_space<vmem>>, vector<1x32xf32>
    %11 = vector.broadcast %10 : vector<1x32xf32> to vector<8x32xf32>
    %12 = arith.addf %9, %11 : vector<8x32xf32>
    %cst_11 = arith.constant 0.000000e+00 : f32
    %13 = vector.broadcast %cst_11 : f32 to vector<8x32xf32>
    %14 = arith.maximumf %12, %13 : vector<8x32xf32>
    %c0_12 = arith.constant 0 : index
    %c0_13 = arith.constant 0 : index
    %15 = vector.load %arg6[%c0_12, %c0_13] : memref<32x32xf32, #tpu.memory_space<vmem>>, vector<32x32xf32>
    %cst_14 = arith.constant dense<0.000000e+00> : vector<8x32xf32>
    %16 = tpu.matmul %14, %15, %cst_14 {dimension_numbers = #tpu.dot_dimension_numbers<[1], [0], [0], [1], [0, 0, 1, 1], [], []>} : vector<8x32xf32>, vector<32x32xf32>, vector<8x32xf32> -> vector<8x32xf32>
    %c0_15 = arith.constant 0 : index
    %c0_16 = arith.constant 0 : index
    %17 = vector.load %arg7[%c0_15, %c0_16] : memref<1x32xf32, #tpu.memory_space<vmem>>, vector<1x32xf32>
    %18 = vector.broadcast %17 : vector<1x32xf32> to vector<8x32xf32>
    %19 = arith.addf %16, %18 : vector<8x32xf32>
    %cst_17 = arith.constant 0.000000e+00 : f32
    %20 = vector.broadcast %cst_17 : f32 to vector<8x32xf32>
    %21 = arith.maximumf %19, %20 : vector<8x32xf32>
    %c0_18 = arith.constant 0 : index
    %c0_19 = arith.constant 0 : index
    %22 = vector.load %arg8[%c0_18, %c0_19] : memref<32x10xf32, #tpu.memory_space<vmem>>, vector<32x10xf32>
    %cst_20 = arith.constant dense<0.000000e+00> : vector<8x10xf32>
    %23 = tpu.matmul %21, %22, %cst_20 {dimension_numbers = #tpu.dot_dimension_numbers<[1], [0], [0], [1], [0, 0, 1, 1], [], []>} : vector<8x32xf32>, vector<32x10xf32>, vector<8x10xf32> -> vector<8x10xf32>
    %c0_21 = arith.constant 0 : index
    %c0_22 = arith.constant 0 : index
    %24 = vector.load %arg9[%c0_21, %c0_22] : memref<1x10xf32, #tpu.memory_space<vmem>>, vector<1x10xf32>
    %25 = vector.broadcast %24 : vector<1x10xf32> to vector<8x10xf32>
    %26 = arith.addf %23, %25 : vector<8x10xf32>
    %cst_23 = arith.constant dense<0xFF800000> : vector<8xf32>
    %27 = vector.multi_reduction <maximumf>, %26, %cst_23 [1] : vector<8x10xf32> to vector<8xf32>
    %28 = vector.shape_cast %27 : vector<8xf32> to vector<8x1xf32>
    %29 = vector.broadcast %28 : vector<8x1xf32> to vector<8x10xf32>
    %30 = arith.subf %26, %29 : vector<8x10xf32>
    %31 = math.exp %30 : vector<8x10xf32>
    %cst_24 = arith.constant dense<0.000000e+00> : vector<8xf32>
    %32 = vector.multi_reduction <add>, %31, %cst_24 [1] : vector<8x10xf32> to vector<8xf32>
    %33 = vector.shape_cast %32 : vector<8xf32> to vector<8x1xf32>
    %34 = tpu.reciprocal %33 {approx = true} : vector<8x1xf32> -> vector<8x1xf32>
    %35 = arith.mulf %33, %34 : vector<8x1xf32>
    %cst_25 = arith.constant 2.000000e+00 : f32
    %36 = vector.broadcast %cst_25 : f32 to vector<8x1xf32>
    %37 = arith.subf %36, %35 : vector<8x1xf32>
    %38 = arith.mulf %34, %37 : vector<8x1xf32>
    %39 = vector.broadcast %38 : vector<8x1xf32> to vector<8x10xf32>
    %40 = arith.mulf %31, %39 : vector<8x10xf32>
    %c0_26 = arith.constant 0 : index
    %c0_27 = arith.constant 0 : index
    %41 = vector.load %arg10[%c0_26, %c0_27] : memref<8x10xf32, #tpu.memory_space<vmem>>, vector<8x10xf32>
    tpu.vector_store %arg10[%c0_26, %c0_27], %40 {strides = array<i32>} : memref<8x10xf32, #tpu.memory_space<vmem>>, vector<8x10xf32>,
    return
  }
  func.func @transform_0(%arg0: i32) -> (i32, i32) {
    %c0_i32 = arith.constant 0 : i32
    %c0_i32_0 = arith.constant 0 : i32
    return %arg0, %c0_i32 : i32, i32
  }
  func.func @transform_1(%arg0: i32) -> (i32, i32) {
    %c0_i32 = arith.constant 0 : i32
    %c0_i32_0 = arith.constant 0 : i32
    %c0_i32_1 = arith.constant 0 : i32
    return %c0_i32, %c0_i32_0 : i32, i32
  }
  func.func @transform_2(%arg0: i32) -> (i32, i32) {
    %c0_i32 = arith.constant 0 : i32
    %c0_i32_0 = arith.constant 0 : i32
    %c0_i32_1 = arith.constant 0 : i32
    return %c0_i32, %c0_i32_0 : i32, i32
  }
  func.func @transform_3(%arg0: i32) -> (i32, i32) {
    %c0_i32 = arith.constant 0 : i32
    %c0_i32_0 = arith.constant 0 : i32
    %c0_i32_1 = arith.constant 0 : i32
    return %c0_i32, %c0_i32_0 : i32, i32
  }
  func.func @transform_4(%arg0: i32) -> (i32, i32) {
    %c0_i32 = arith.constant 0 : i32
    %c0_i32_0 = arith.constant 0 : i32
    %c0_i32_1 = arith.constant 0 : i32
    return %c0_i32, %c0_i32_0 : i32, i32
  }
  func.func @transform_5(%arg0: i32) -> (i32, i32) {
    %c0_i32 = arith.constant 0 : i32
    %c0_i32_0 = arith.constant 0 : i32
    %c0_i32_1 = arith.constant 0 : i32
    return %c0_i32, %c0_i32_0 : i32, i32
  }
  func.func @transform_6(%arg0: i32) -> (i32, i32) {
    %c0_i32 = arith.constant 0 : i32
    %c0_i32_0 = arith.constant 0 : i32
    %c0_i32_1 = arith.constant 0 : i32
    return %c0_i32, %c0_i32_0 : i32, i32
  }
  func.func @transform_7(%arg0: i32) -> (i32, i32) {
    %c0_i32 = arith.constant 0 : i32
    %c0_i32_0 = arith.constant 0 : i32
    %c0_i32_1 = arith.constant 0 : i32
    return %c0_i32, %c0_i32_0 : i32, i32
  }
  func.func @transform_8(%arg0: i32) -> (i32, i32) {
    %c0_i32 = arith.constant 0 : i32
    %c0_i32_0 = arith.constant 0 : i32
    %c0_i32_1 = arith.constant 0 : i32
    return %c0_i32, %c0_i32_0 : i32, i32
  }
  func.func @transform_9(%arg0: i32) -> (i32, i32) {
    %c0_i32 = arith.constant 0 : i32
    %c0_i32_0 = arith.constant 0 : i32
    return %arg0, %c0_i32 : i32, i32
  }
}

</mosaic_0001>

<bundles_post_ra>
// kernel: tpu_custom_call.1
= control target key start
LH: loop header
LB: loop body
LE: loop exit
PB: predicated region body
PF: predicated region fallthrough
CT: control target
= control target key end

     0   :  { %vm42_vm0 = vcmask 261120   ;;  %s373_s0 = inlined_call_operand.vmem [shape: f32[8,32], index: 0, kind: input, shape index: {}]   ;;  %s374_s1 = inlined_call_operand.vmem [shape: f32[32,64], index: 1, kind: input, shape index: {}]   ;;  %s375_s2 = inlined_call_operand.vmem [shape: f32[1,64], index: 2, kind: input, shape index: {}]   ;;  %s376_s3 = inlined_call_operand.vmem [shape: f32[64,32], index: 3, kind: input, shape index: {}]   ;;  %s377_s4 = inlined_call_operand.vmem [shape: f32[1,32], index: 4, kind: input, shape index: {}]   ;;  %s378_s5 = inlined_call_operand.vmem [shape: f32[32,32], index: 5, kind: input, shape index: {}]   ;;  %s379_s6 = inlined_call_operand.vmem [shape: f32[1,32], index: 6, kind: input, shape index: {}]   ;;  %s380_s7 = inlined_call_operand.vmem [shape: f32[32,10], index: 7, kind: input, shape index: {}]   ;;  %s381_s8 = inlined_call_operand.vmem [shape: f32[1,10], index: 8, kind: input, shape index: {}]   ;;  %s382_s9 = inlined_call_operand.hbm [shape: f32[8,10], index: 9, kind: output, shape index: {}]  }
   0x1   :  { %v37_v0 = vld [vmem:[%s374_s1 + $0x18] sm:$0xff]  ;;  %v36_v1 = vld [vmem:[%s374_s1 + $0x10] sm:$0xff]  ;;  %v35_v3 = vld [vmem:[%s374_s1 + $0x8] sm:$0xff] }
   0x2   :  { %58 = vmatpush.msra.mxu0 %v37_v0  ;;  %v74_v2 = vld [vmem:[%s376_s3 + $0x38] sm:$0xff]  ;;  %v73_v4 = vld [vmem:[%s376_s3 + $0x30] sm:$0xff]  ;;  %v34_v5 = vld [vmem:[%s374_s1] sm:$0xff] }
   0x3   :  { %91 = vmatpush.msra.mxu1 %v74_v2  ;;  %v72_v6 = vld [vmem:[%s376_s3 + $0x28] sm:$0xff]  ;;  %v33_v7 = vld [vmem:[%s373_s0] sm:$0xff] }
   0x4   :  { %59 = vmatpush.msra.mxu0 %v36_v1  ;;  %v71_v8 = vld [vmem:[%s376_s3 + $0x20] sm:$0xff] }
   0x5   :  { %92 = vmatpush.msra.mxu1 %v73_v4 }
   0x6   :  { %60 = vmatpush.msra.mxu0 %v35_v3 }
   0x7   :  { %14 = vsyncpa [#allocation3], 0  ;;  %93 = vmatpush.msra.mxu1 %v72_v6  ;;  %v70_v9 = vld [vmem:[%s376_s3 + $0x18] sm:$0xff]  ;;  %v69_v10 = vld [vmem:[%s376_s3 + $0x10] sm:$0xff]  ;;  %vm79_vm1 = vcmask 523264   ;;  %vm167_vm2 = vcmask 80896  }
   0x8   :  { %61 = vmatpush.msra.mxu0 %v34_v5  ;;  %v68_v11 = vld [vmem:[%s376_s3 + $0x8] sm:$0xff]  ;;  %v67_v12 = vld [vmem:[%s376_s3] sm:$0xff]  ;;  %v107_v13 = vld [vmem:[%s378_s5 + $0x18] sm:$0xff]  ;;  %s190_s10 = sshll.u32 %s382_s9, 4  ;;  %s191_s10 = int_to_ptr.hbm [resolvable:$true] %s190_s10 }
   0x9   :  { %199 = vmatmul.msk.f32.vlgmr.msra.gmra.mxu0 %vm42_vm0, %v33_v7  ;;  %94 = vmatpush.msra.mxu1 %v71_v8  ;;  %v204_v14 = vld [vmem:[%s375_s2] ss:$0 sm:$0xff]  ;;  %v106_v18 = vld [vmem:[%s378_s5 + $0x10] sm:$0xff]  ;;  %v105_v19 = vld [vmem:[%s378_s5 + $0x8] sm:$0xff] }
   0xa   :  { %127 = vmatpush.msra.mxu2 %v107_v13  ;;  %v104_v20 = vld [vmem:[%s378_s5] sm:$0xff]  ;;  %v139_v21 = vld [vmem:[%s380_s7 + $0x18] sm:$0xff]  ;;  %v138_v26 = vld [vmem:[%s380_s7 + $0x10] sm:$0xff] }
   0xb   :  { %95 = vmatpush.msra.mxu1 %v70_v9  ;;  %159 = vmatpush.msra.mxu3 %v139_v21  ;;  %v205_v22 = vld [vmem:[%s377_s4] ss:$0 sm:$0xff]  ;;  %v137_v27 = vld [vmem:[%s380_s7 + $0x8] sm:$0xff] }
   0xc   :  { %128 = vmatpush.msra.mxu2 %v106_v18  ;;  %v136_v28 = vld [vmem:[%s380_s7] sm:$0xff] }
   0xd   :  { %96 = vmatpush.msra.mxu1 %v69_v10  ;;  %160 = vmatpush.msra.mxu3 %v138_v26  ;;  %v206_v29 = vld [vmem:[%s379_s6] ss:$0 sm:$0xff]  ;;  %s238_s6 = smov [#allocation2]  }
   0xe   :  { %129 = vmatpush.msra.mxu2 %v105_v19  ;;  %v207_v33 = vld [vmem:[%s381_s8] ss:$0 sm:$0xff]  ;;  %s188_s7 = sshll.u32 %s238_s6, 4  ;;  %s189_s7 = int_to_ptr.vmem [resolvable:$true] %s188_s7 }
   0xf   :  { %97 = vmatpush.msra.mxu1 %v68_v11  ;;  %161 = vmatpush.msra.mxu3 %v137_v27 }
  0x10   :  { %130 = vmatpush.msra.mxu2 %v104_v20 }
  0x11   :  { %98 = vmatpush.msra.mxu1 %v67_v12  ;;  %162 = vmatpush.msra.mxu3 %v136_v28 }
  0x86   :  { %v63_v15 = vpop.f32.mrf.mxu0 }
  0x87   :  { %v64_v16 = vadd.f32 %v204_v14, %v63_v15 }
  0x89   :  { %v66_v17 = vmax.f32 %v64_v16, 0.0 }
  0x8b   :  { %200 = vmatmul.msk.f32.vlgmr.msra.gmra.mxu1 %vm79_vm1, %v66_v17 }
 0x108   :  { %v100_v23 = vpop.f32.mrf.mxu1 }
 0x109   :  { %v101_v24 = vadd.f32 %v205_v22, %v100_v23 }
 0x10b   :  { %v103_v25 = vmax.f32 %v101_v24, 0.0 }
 0x10d   :  { %201 = vmatmul.msk.f32.vlgmr.msra.gmra.mxu2 %vm42_vm0, %v103_v25 }
 0x190   :  { %v132_v30 = vpop.f32.mrf.mxu2 }
 0x191   :  { %v133_v31 = vadd.f32 %v206_v29, %v132_v30 }
 0x193   :  { %v135_v32 = vmax.f32 %v133_v31, 0.0 }
 0x195   :  { %202 = vmatmul.msk.f32.vlgmr.msra.gmra.mxu3 %vm42_vm0, %v135_v32 }
 0x218   :  { %v164_v34 = vpop.f32.mrf.mxu3 }
 0x219   :  { %v165_v35 = vadd.f32 %v207_v33, %v164_v34 }
 0x21b   :  { %v168_v36 = vsel %vm167_vm2, %v165_v35, -inf }
 0x21c   :  { %169 = vmax.xlane.f32.xlu0 %v168_v36 }
 0x28f   :  { %v170_v37 = vpop.xlane.xlu0 %169 }
 0x290   :  { %v171_v38 = vsub.f32 %v165_v35, %v170_v37 }
 0x292   :  { %v172_v39 = vmul.f32 1.442695, %v171_v38 }
 0x294   :  { %208 = vpow2.f32 %v172_v39 }
 0x29a   :  { %v209_v40 = vpop.eup %208 }
 0x29b   :  { %v174_v41 = vsel %vm167_vm2, %v209_v40, 0.0 }
 0x29c   :  { %175 = vadd.xlane.f32.xlu0 %v174_v41 }
 0x30f   :  { %v176_v42 = vpop.xlane.xlu0 %175 }
 0x310   :  { %210 = vrcp.f32 %v176_v42 }
 0x316   :  { %v211_v43 = vpop.eup %210 }
 0x317   :  { %v178_v44 = vmul.f32 %v211_v43, %v176_v42 }
 0x319   :  { %v179_v45 = vsub.f32 2.0, %v178_v44 }
 0x31b   :  { %v180_v46 = vmul.f32 %v211_v43, %v179_v45 }
 0x31d   :  { %v181_v47 = vmul.f32 %v209_v40, %v180_v46 }
 0x31f   :  { %182 = vst.msk [vmem:[#allocation2] sm:$0xff] %vm167_vm2, %v181_v47 }
 0x320   :  { %193 = dma.vmem_to_hbm [thread:$0]  %s189_s7, 128, %s191_s10, [#allocation3]  }
 0x321   :  { %236 = dma.done.wait [#allocation3], 128  }
 0x322   :  { %237 = vsyncadd [#allocation3], 4294967168 }
 0x323   :  { %198 = vsyncpa [#allocation3], 1 }

</bundles_post_ra>
